<compile_context>
chip_gen: v7x
topology: tpu7x:2x2x1
jax: 0.10.0
libtpu: 0.0.40
codegen_flags: <defaults>
</compile_context>

<pallas_src>
import jax
import jax.numpy as jnp
from jax.experimental import pallas as pl
from jax.experimental.pallas import tpu as pltpu

LANE = 128


def _round_up(x, m):
    return ((x + m - 1) // m) * m


def mlp_kernel(x_ref, w1_ref, b1_ref, w2_ref, b2_ref, w3_ref, b3_ref,
               o_ref, h1_ref, h2_ref):
    # Layer 1: Linear(inf_p -> hid_p), f32 accumulation into explicit VMEM scratch.
    h1_ref[...] = jnp.dot(x_ref[...], w1_ref[...], preferred_element_type=jnp.float32)
    # Bias + ReLU in f32 (b1 is (1, hid_p), broadcasts); cast back to MXU dtype.
    a1 = jnp.maximum(h1_ref[...] + b1_ref[...], 0.0).astype(w2_ref.dtype)

    # Layer 2: Linear(hid_p -> hid_p) + ReLU.
    h2_ref[...] = jnp.dot(a1, w2_ref[...], preferred_element_type=jnp.float32)
    a2 = jnp.maximum(h2_ref[...] + b2_ref[...], 0.0).astype(w3_ref.dtype)

    # Layer 3: Linear(hid_p -> outf_p), logits.  Lane-dense (128-mult) store.
    out = jnp.dot(a2, w3_ref[...], preferred_element_type=jnp.float32)
    o_ref[...] = (out + b3_ref[...]).astype(o_ref.dtype)


def prepare_exercise_params(w1, b1, w2, b2, w3, b3, *, compute_dtype=jnp.float32):
    """Pad (and cast) parameters ONCE at model-init time.

    Weights stored (in_features, out_features), i.e. PyTorch W.T.
    Biases are kept in f32 (bias + ReLU epilogue stays f32 on all chips).
    Padded rows/columns are zero so they contribute exact zeros.
    """
    inf, hidden = w1.shape
    outf = w3.shape[1]
    inf_p = _round_up(inf, 8)           # sublane-align only; inf is a full-dim block
    hid_p = _round_up(hidden, LANE)
    outf_p = _round_up(outf, LANE)      # lane-dense output store (no masked vst)

    w1p = jnp.zeros((inf_p, hid_p), compute_dtype).at[:inf, :hidden].set(
        w1.astype(compute_dtype))
    b1p = jnp.zeros((1, hid_p), jnp.float32).at[0, :hidden].set(b1.astype(jnp.float32))
    w2p = jnp.zeros((hid_p, hid_p), compute_dtype).at[:hidden, :hidden].set(
        w2.astype(compute_dtype))
    b2p = jnp.zeros((1, hid_p), jnp.float32).at[0, :hidden].set(b2.astype(jnp.float32))
    w3p = jnp.zeros((hid_p, outf_p), compute_dtype).at[:hidden, :outf].set(
        w3.astype(compute_dtype))
    b3p = jnp.zeros((1, outf_p), jnp.float32).at[0, :outf].set(b3.astype(jnp.float32))

    dims = dict(inf=inf, hidden=hidden, outf=outf,
                inf_p=inf_p, hid_p=hid_p, outf_p=outf_p)
    return (w1p, b1p, w2p, b2p, w3p, b3p), dims


def _choose_tm(n, tm_max):
    # MXU M-dim is 256 on v6e/v7x (128 on v5e); amortize the ~0.35us/step overhead.
    if n >= 1024:
        return min(tm_max, 512)
    if n >= 256:
        return min(tm_max, 256)
    return _round_up(n, 8)


def exercise_model_forward(x, params, dims, *, tm_max=512):
    """Pallas forward for ExerciseModel.

    x:      (N, inf) float32 (cast/padded per call only — params are pre-padded).
    params: output of prepare_exercise_params().
    returns (N, outf) float32.
    """
    w1p, b1p, w2p, b2p, w3p, b3p = params
    compute_dtype = w1p.dtype
    n, inf = x.shape
    inf_p, hid_p, outf_p = dims["inf_p"], dims["hid_p"], dims["outf_p"]

    tm = _choose_tm(n, tm_max)
    n_p = _round_up(n, tm)

    # Per-call: pad/cast only x (weights were padded once at init).
    if (n_p, inf_p) == x.shape:
        xp = x.astype(compute_dtype)
    else:
        xp = jnp.zeros((n_p, inf_p), compute_dtype).at[:n, :inf].set(
            x.astype(compute_dtype))

    grid_steps = n_p // tm
    grid = (grid_steps,)
    # Megacore sharding only pays when each TC gets real work; otherwise it just
    # duplicates the resident-weight DMA (v7x).
    semantics = ("parallel",) if grid_steps >= 2 else ("arbitrary",)

    w_itemsize = jnp.dtype(compute_dtype).itemsize
    x_itemsize = w_itemsize
    weight_bytes = (w1p.size + w2p.size + w3p.size) * w_itemsize
    bias_bytes = (b1p.size + b2p.size + b3p.size) * 4

    cost = pl.CostEstimate(
        flops=2 * n_p * (inf_p * hid_p + hid_p * hid_p + hid_p * outf_p),
        transcendentals=0,
        bytes_accessed=xp.size * x_itemsize + weight_bytes + bias_bytes
        + n_p * outf_p * 4,
    )

    def build(single_buffer_weights):
        if single_buffer_weights:
            resident = lambda a: pl.BlockSpec(
                a.shape, lambda i: (0,) * a.ndim, pipeline_mode=pl.Buffered(1))
            w_bufs = 1
        else:
            resident = lambda a: pl.BlockSpec(a.shape, lambda i: (0,) * a.ndim)
            w_bufs = 2

        vmem_needed = (
            w_bufs * weight_bytes
            + 2 * bias_bytes
            + 2 * tm * inf_p * x_itemsize      # double-buffered x tile
            + 2 * tm * outf_p * 4              # double-buffered out tile
            + 2 * tm * hid_p * 4               # h1/h2 f32 scratch
        )
        vmem_limit = int(vmem_needed * 1.25) + (2 << 20)
        vmem_limit = max(vmem_limit, 16 << 20)
        vmem_limit = min(vmem_limit, 128 << 20)

        return pl.pallas_call(
            mlp_kernel,
            out_shape=jax.ShapeDtypeStruct((n_p, outf_p), jnp.float32),
            grid=grid,
            in_specs=[
                pl.BlockSpec((tm, inf_p), lambda i: (i, 0)),   # x: batch-tiled
                resident(w1p), resident(b1p),
                resident(w2p), resident(b2p),
                resident(w3p), resident(b3p),
            ],
            out_specs=pl.BlockSpec((tm, outf_p), lambda i: (i, 0)),
            scratch_shapes=[
                pltpu.VMEM((tm, hid_p), jnp.float32),          # h1 accumulator
                pltpu.VMEM((tm, hid_p), jnp.float32),          # h2 accumulator
            ],
            compiler_params=pltpu.CompilerParams(
                dimension_semantics=semantics,
                vmem_limit_bytes=vmem_limit,
            ),
            cost_estimate=cost,
        )

    try:
        out_padded = build(True)(xp, w1p, b1p, w2p, b2p, w3p, b3p)
    except Exception:
        # Fallback if this Pallas build rejects single-buffered (Buffered(1)) specs.
        out_padded = build(False)(xp, w1p, b1p, w2p, b2p, w3p, b3p)

    return out_padded[:n, :dims["outf"]]


def reference_forward(x, w1, b1, w2, b2, w3, b3):
    h1 = jnp.maximum(x @ w1 + b1, 0.0)
    h2 = jnp.maximum(h1 @ w2 + b2, 0.0)
    return h2 @ w3 + b3


if __name__ == "__main__":
    # Small shapes consistent with ExerciseModel(inf, outf, hidden)
    batch, inf, hidden, outf = 8, 32, 32, 4

    key = jax.random.PRNGKey(0)
    kx, k1, k2, k3, k4, k5, k6 = jax.random.split(key, 7)

    x = jax.random.normal(kx, (batch, inf), dtype=jnp.float32)

    # Deterministic PyTorch-like init: uniform(-1/sqrt(fan_in), +1/sqrt(fan_in)).
    def init_linear(kw, kb, fan_in, fan_out):
        bound = 1.0 / jnp.sqrt(jnp.float32(fan_in))
        w = jax.random.uniform(kw, (fan_in, fan_out), jnp.float32, -bound, bound)
        b = jax.random.uniform(kb, (fan_out,), jnp.float32, -bound, bound)
        return w, b

    w1, b1 = init_linear(k1, k2, inf, hidden)
    w2, b2 = init_linear(k3, k4, hidden, hidden)
    w3, b3 = init_linear(k5, k6, hidden, outf)

    ref = reference_forward(x, w1, b1, w2, b2, w3, b3)

    # Exact f32 path (MXU operands f32, f32 accumulation).
    params_f32, dims = prepare_exercise_params(
        w1, b1, w2, b2, w3, b3, compute_dtype=jnp.float32)
    out_f32 = jax.block_until_ready(exercise_model_forward(x, params_f32, dims))
    assert out_f32.shape == (batch, outf)
    assert jnp.allclose(out_f32, ref, atol=1e-5, rtol=1e-5)

    # bf16 MXU-operand fast path (v6e/v7x); f32 accumulation bounds the error.
    params_bf16, dims_bf = prepare_exercise_params(
        w1, b1, w2, b2, w3, b3, compute_dtype=jnp.bfloat16)
    out_bf16 = jax.block_until_ready(exercise_model_forward(x, params_bf16, dims_bf))
    assert out_bf16.shape == (batch, outf)
    assert jnp.allclose(out_bf16, ref, atol=5e-2, rtol=5e-2)

    print("KERNEL_OK")
</pallas_src>

<mosaic_0001>
module attributes {stable_mosaic.version = 11 : i64} {
  func.func @mlp_kernel(%arg0: i32, %arg1: memref<8x32xf32, #tpu.memory_space<vmem>>, %arg2: memref<32x128xf32, #tpu.memory_space<vmem>>, %arg3: memref<1x128xf32, #tpu.memory_space<vmem>>, %arg4: memref<128x128xf32, #tpu.memory_space<vmem>>, %arg5: memref<1x128xf32, #tpu.memory_space<vmem>>, %arg6: memref<128x128xf32, #tpu.memory_space<vmem>>, %arg7: memref<1x128xf32, #tpu.memory_space<vmem>>, %arg8: memref<8x128xf32, #tpu.memory_space<vmem>>, %arg9: memref<8x128xf32, #tpu.memory_space<vmem>>, %arg10: memref<8x128xf32, #tpu.memory_space<vmem>>) attributes {dimension_semantics = [#tpu.dimension_semantics<arbitrary>], iteration_bounds = array<i64: 1>, scalar_prefetch = 0 : i64, scratch_operands = 2 : i64, tpu.core_type = #tpu.core_type<tc>, window_params = [{transform_indices = @transform_0, window_bounds = array<i64: 8, 32>}, {pipeline_mode = #tpu.pipeline_mode<synchronous>, transform_indices = @transform_1, window_bounds = array<i64: 32, 128>}, {pipeline_mode = #tpu.pipeline_mode<synchronous>, transform_indices = @transform_2, window_bounds = array<i64: 1, 128>}, {pipeline_mode = #tpu.pipeline_mode<synchronous>, transform_indices = @transform_3, window_bounds = array<i64: 128, 128>}, {pipeline_mode = #tpu.pipeline_mode<synchronous>, transform_indices = @transform_4, window_bounds = array<i64: 1, 128>}, {pipeline_mode = #tpu.pipeline_mode<synchronous>, transform_indices = @transform_5, window_bounds = array<i64: 128, 128>}, {pipeline_mode = #tpu.pipeline_mode<synchronous>, transform_indices = @transform_6, window_bounds = array<i64: 1, 128>}, {transform_indices = @transform_7, window_bounds = array<i64: 8, 128>}]} {
    %c0 = arith.constant 0 : index
    %c0_0 = arith.constant 0 : index
    %0 = vector.load %arg1[%c0, %c0_0] : memref<8x32xf32, #tpu.memory_space<vmem>>, vector<8x32xf32>
    %c0_1 = arith.constant 0 : index
    %c0_2 = arith.constant 0 : index
    %1 = vector.load %arg2[%c0_1, %c0_2] : memref<32x128xf32, #tpu.memory_space<vmem>>, vector<32x128xf32>
    %cst = arith.constant dense<0.000000e+00> : vector<8x128xf32>
    %2 = tpu.matmul %0, %1, %cst {dimension_numbers = #tpu.dot_dimension_numbers<[1], [0], [0], [1], [0, 0, 1, 1], [], []>} : vector<8x32xf32>, vector<32x128xf32>, vector<8x128xf32> -> vector<8x128xf32>
    %c0_3 = arith.constant 0 : index
    %c0_4 = arith.constant 0 : index
    %3 = vector.load %arg9[%c0_3, %c0_4] : memref<8x128xf32, #tpu.memory_space<vmem>>, vector<8x128xf32>
    tpu.vector_store %arg9[%c0_3, %c0_4], %2 {strides = array<i32>} : memref<8x128xf32, #tpu.memory_space<vmem>>, vector<8x128xf32>,
    %c0_5 = arith.constant 0 : index
    %c0_6 = arith.constant 0 : index
    %4 = vector.load %arg9[%c0_5, %c0_6] : memref<8x128xf32, #tpu.memory_space<vmem>>, vector<8x128xf32>
    %c0_7 = arith.constant 0 : index
    %c0_8 = arith.constant 0 : index
    %5 = vector.load %arg3[%c0_7, %c0_8] : memref<1x128xf32, #tpu.memory_space<vmem>>, vector<1x128xf32>
    %6 = vector.broadcast %5 : vector<1x128xf32> to vector<8x128xf32>
    %7 = arith.addf %4, %6 : vector<8x128xf32>
    %cst_9 = arith.constant 0.000000e+00 : f32
    %8 = vector.broadcast %cst_9 : f32 to vector<8x128xf32>
    %9 = arith.maximumf %7, %8 : vector<8x128xf32>
    %c0_10 = arith.constant 0 : index
    %c0_11 = arith.constant 0 : index
    %10 = vector.load %arg4[%c0_10, %c0_11] : memref<128x128xf32, #tpu.memory_space<vmem>>, vector<128x128xf32>
    %cst_12 = arith.constant dense<0.000000e+00> : vector<8x128xf32>
    %11 = tpu.matmul %9, %10, %cst_12 {dimension_numbers = #tpu.dot_dimension_numbers<[1], [0], [0], [1], [0, 0, 1, 1], [], []>} : vector<8x128xf32>, vector<128x128xf32>, vector<8x128xf32> -> vector<8x128xf32>
    %c0_13 = arith.constant 0 : index
    %c0_14 = arith.constant 0 : index
    %12 = vector.load %arg10[%c0_13, %c0_14] : memref<8x128xf32, #tpu.memory_space<vmem>>, vector<8x128xf32>
    tpu.vector_store %arg10[%c0_13, %c0_14], %11 {strides = array<i32>} : memref<8x128xf32, #tpu.memory_space<vmem>>, vector<8x128xf32>,
    %c0_15 = arith.constant 0 : index
    %c0_16 = arith.constant 0 : index
    %13 = vector.load %arg10[%c0_15, %c0_16] : memref<8x128xf32, #tpu.memory_space<vmem>>, vector<8x128xf32>
    %c0_17 = arith.constant 0 : index
    %c0_18 = arith.constant 0 : index
    %14 = vector.load %arg5[%c0_17, %c0_18] : memref<1x128xf32, #tpu.memory_space<vmem>>, vector<1x128xf32>
    %15 = vector.broadcast %14 : vector<1x128xf32> to vector<8x128xf32>
    %16 = arith.addf %13, %15 : vector<8x128xf32>
    %cst_19 = arith.constant 0.000000e+00 : f32
    %17 = vector.broadcast %cst_19 : f32 to vector<8x128xf32>
    %18 = arith.maximumf %16, %17 : vector<8x128xf32>
    %c0_20 = arith.constant 0 : index
    %c0_21 = arith.constant 0 : index
    %19 = vector.load %arg6[%c0_20, %c0_21] : memref<128x128xf32, #tpu.memory_space<vmem>>, vector<128x128xf32>
    %cst_22 = arith.constant dense<0.000000e+00> : vector<8x128xf32>
    %20 = tpu.matmul %18, %19, %cst_22 {dimension_numbers = #tpu.dot_dimension_numbers<[1], [0], [0], [1], [0, 0, 1, 1], [], []>} : vector<8x128xf32>, vector<128x128xf32>, vector<8x128xf32> -> vector<8x128xf32>
    %c0_23 = arith.constant 0 : index
    %c0_24 = arith.constant 0 : index
    %21 = vector.load %arg7[%c0_23, %c0_24] : memref<1x128xf32, #tpu.memory_space<vmem>>, vector<1x128xf32>
    %22 = vector.broadcast %21 : vector<1x128xf32> to vector<8x128xf32>
    %23 = arith.addf %20, %22 : vector<8x128xf32>
    %c0_25 = arith.constant 0 : index
    %c0_26 = arith.constant 0 : index
    %24 = vector.load %arg8[%c0_25, %c0_26] : memref<8x128xf32, #tpu.memory_space<vmem>>, vector<8x128xf32>
    tpu.vector_store %arg8[%c0_25, %c0_26], %23 {strides = array<i32>} : memref<8x128xf32, #tpu.memory_space<vmem>>, vector<8x128xf32>,
    return
  }
  func.func @transform_0(%arg0: i32) -> (i32, i32) {
    %c0_i32 = arith.constant 0 : i32
    %c0_i32_0 = arith.constant 0 : i32
    return %arg0, %c0_i32 : i32, i32
  }
  func.func @transform_1(%arg0: i32) -> (i32, i32) {
    %c0_i32 = arith.constant 0 : i32
    %c0_i32_0 = arith.constant 0 : i32
    %c0_i32_1 = arith.constant 0 : i32
    return %c0_i32, %c0_i32_0 : i32, i32
  }
  func.func @transform_2(%arg0: i32) -> (i32, i32) {
    %c0_i32 = arith.constant 0 : i32
    %c0_i32_0 = arith.constant 0 : i32
    %c0_i32_1 = arith.constant 0 : i32
    return %c0_i32, %c0_i32_0 : i32, i32
  }
  func.func @transform_3(%arg0: i32) -> (i32, i32) {
    %c0_i32 = arith.constant 0 : i32
    %c0_i32_0 = arith.constant 0 : i32
    %c0_i32_1 = arith.constant 0 : i32
    return %c0_i32, %c0_i32_0 : i32, i32
  }
  func.func @transform_4(%arg0: i32) -> (i32, i32) {
    %c0_i32 = arith.constant 0 : i32
    %c0_i32_0 = arith.constant 0 : i32
    %c0_i32_1 = arith.constant 0 : i32
    return %c0_i32, %c0_i32_0 : i32, i32
  }
  func.func @transform_5(%arg0: i32) -> (i32, i32) {
    %c0_i32 = arith.constant 0 : i32
    %c0_i32_0 = arith.constant 0 : i32
    %c0_i32_1 = arith.constant 0 : i32
    return %c0_i32, %c0_i32_0 : i32, i32
  }
  func.func @transform_6(%arg0: i32) -> (i32, i32) {
    %c0_i32 = arith.constant 0 : i32
    %c0_i32_0 = arith.constant 0 : i32
    %c0_i32_1 = arith.constant 0 : i32
    return %c0_i32, %c0_i32_0 : i32, i32
  }
  func.func @transform_7(%arg0: i32) -> (i32, i32) {
    %c0_i32 = arith.constant 0 : i32
    %c0_i32_0 = arith.constant 0 : i32
    return %arg0, %c0_i32 : i32, i32
  }
}

module attributes {stable_mosaic.version = 11 : i64} {
  func.func @mlp_kernel(%arg0: i32, %arg1: memref<8x32xf32, #tpu.memory_space<vmem>>, %arg2: memref<32x128xf32, #tpu.memory_space<vmem>>, %arg3: memref<1x128xf32, #tpu.memory_space<vmem>>, %arg4: memref<128x128xf32, #tpu.memory_space<vmem>>, %arg5: memref<1x128xf32, #tpu.memory_space<vmem>>, %arg6: memref<128x128xf32, #tpu.memory_space<vmem>>, %arg7: memref<1x128xf32, #tpu.memory_space<vmem>>, %arg8: memref<8x128xf32, #tpu.memory_space<vmem>>, %arg9: memref<8x128xf32, #tpu.memory_space<vmem>>, %arg10: memref<8x128xf32, #tpu.memory_space<vmem>>) attributes {dimension_semantics = [#tpu.dimension_semantics<arbitrary>], iteration_bounds = array<i64: 1>, scalar_prefetch = 0 : i64, scratch_operands = 2 : i64, tpu.core_type = #tpu.core_type<tc>, window_params = [{transform_indices = @transform_0, window_bounds = array<i64: 8, 32>}, {pipeline_mode = #tpu.pipeline_mode<synchronous>, transform_indices = @transform_1, window_bounds = array<i64: 32, 128>}, {pipeline_mode = #tpu.pipeline_mode<synchronous>, transform_indices = @transform_2, window_bounds = array<i64: 1, 128>}, {pipeline_mode = #tpu.pipeline_mode<synchronous>, transform_indices = @transform_3, window_bounds = array<i64: 128, 128>}, {pipeline_mode = #tpu.pipeline_mode<synchronous>, transform_indices = @transform_4, window_bounds = array<i64: 1, 128>}, {pipeline_mode = #tpu.pipeline_mode<synchronous>, transform_indices = @transform_5, window_bounds = array<i64: 128, 128>}, {pipeline_mode = #tpu.pipeline_mode<synchronous>, transform_indices = @transform_6, window_bounds = array<i64: 1, 128>}, {transform_indices = @transform_7, window_bounds = array<i64: 8, 128>}]} {
    %c0 = arith.constant 0 : index
    %c0_0 = arith.constant 0 : index
    %0 = vector.load %arg1[%c0, %c0_0] : memref<8x32xf32, #tpu.memory_space<vmem>>, vector<8x32xf32>
    %c0_1 = arith.constant 0 : index
    %c0_2 = arith.constant 0 : index
    %1 = vector.load %arg2[%c0_1, %c0_2] : memref<32x128xf32, #tpu.memory_space<vmem>>, vector<32x128xf32>
    %cst = arith.constant dense<0.000000e+00> : vector<8x128xf32>
    %2 = tpu.matmul %0, %1, %cst {dimension_numbers = #tpu.dot_dimension_numbers<[1], [0], [0], [1], [0, 0, 1, 1], [], []>} : vector<8x32xf32>, vector<32x128xf32>, vector<8x128xf32> -> vector<8x128xf32>
    %c0_3 = arith.constant 0 : index
    %c0_4 = arith.constant 0 : index
    %3 = vector.load %arg9[%c0_3, %c0_4] : memref<8x128xf32, #tpu.memory_space<vmem>>, vector<8x128xf32>
    tpu.vector_store %arg9[%c0_3, %c0_4], %2 {strides = array<i32>} : memref<8x128xf32, #tpu.memory_space<vmem>>, vector<8x128xf32>,
    %c0_5 = arith.constant 0 : index
    %c0_6 = arith.constant 0 : index
    %4 = vector.load %arg9[%c0_5, %c0_6] : memref<8x128xf32, #tpu.memory_space<vmem>>, vector<8x128xf32>
    %c0_7 = arith.constant 0 : index
    %c0_8 = arith.constant 0 : index
    %5 = vector.load %arg3[%c0_7, %c0_8] : memref<1x128xf32, #tpu.memory_space<vmem>>, vector<1x128xf32>
    %6 = vector.broadcast %5 : vector<1x128xf32> to vector<8x128xf32>
    %7 = arith.addf %4, %6 : vector<8x128xf32>
    %cst_9 = arith.constant 0.000000e+00 : f32
    %8 = vector.broadcast %cst_9 : f32 to vector<8x128xf32>
    %9 = arith.maximumf %7, %8 : vector<8x128xf32>
    %c0_10 = arith.constant 0 : index
    %c0_11 = arith.constant 0 : index
    %10 = vector.load %arg4[%c0_10, %c0_11] : memref<128x128xf32, #tpu.memory_space<vmem>>, vector<128x128xf32>
    %cst_12 = arith.constant dense<0.000000e+00> : vector<8x128xf32>
    %11 = tpu.matmul %9, %10, %cst_12 {dimension_numbers = #tpu.dot_dimension_numbers<[1], [0], [0], [1], [0, 0, 1, 1], [], []>} : vector<8x128xf32>, vector<128x128xf32>, vector<8x128xf32> -> vector<8x128xf32>
    %c0_13 = arith.constant 0 : index
    %c0_14 = arith.constant 0 : index
    %12 = vector.load %arg10[%c0_13, %c0_14] : memref<8x128xf32, #tpu.memory_space<vmem>>, vector<8x128xf32>
    tpu.vector_store %arg10[%c0_13, %c0_14], %11 {strides = array<i32>} : memref<8x128xf32, #tpu.memory_space<vmem>>, vector<8x128xf32>,
    %c0_15 = arith.constant 0 : index
    %c0_16 = arith.constant 0 : index
    %13 = vector.load %arg10[%c0_15, %c0_16] : memref<8x128xf32, #tpu.memory_space<vmem>>, vector<8x128xf32>
    %c0_17 = arith.constant 0 : index
    %c0_18 = arith.constant 0 : index
    %14 = vector.load %arg5[%c0_17, %c0_18] : memref<1x128xf32, #tpu.memory_space<vmem>>, vector<1x128xf32>
    %15 = vector.broadcast %14 : vector<1x128xf32> to vector<8x128xf32>
    %16 = arith.addf %13, %15 : vector<8x128xf32>
    %cst_19 = arith.constant 0.000000e+00 : f32
    %17 = vector.broadcast %cst_19 : f32 to vector<8x128xf32>
    %18 = arith.maximumf %16, %17 : vector<8x128xf32>
    %c0_20 = arith.constant 0 : index
    %c0_21 = arith.constant 0 : index
    %19 = vector.load %arg6[%c0_20, %c0_21] : memref<128x128xf32, #tpu.memory_space<vmem>>, vector<128x128xf32>
    %cst_22 = arith.constant dense<0.000000e+00> : vector<8x128xf32>
    %20 = tpu.matmul %18, %19, %cst_22 {dimension_numbers = #tpu.dot_dimension_numbers<[1], [0], [0], [1], [0, 0, 1, 1], [], []>} : vector<8x128xf32>, vector<128x128xf32>, vector<8x128xf32> -> vector<8x128xf32>
    %c0_23 = arith.constant 0 : index
    %c0_24 = arith.constant 0 : index
    %21 = vector.load %arg7[%c0_23, %c0_24] : memref<1x128xf32, #tpu.memory_space<vmem>>, vector<1x128xf32>
    %22 = vector.broadcast %21 : vector<1x128xf32> to vector<8x128xf32>
    %23 = arith.addf %20, %22 : vector<8x128xf32>
    %c0_25 = arith.constant 0 : index
    %c0_26 = arith.constant 0 : index
    %24 = vector.load %arg8[%c0_25, %c0_26] : memref<8x128xf32, #tpu.memory_space<vmem>>, vector<8x128xf32>
    tpu.vector_store %arg8[%c0_25, %c0_26], %23 {strides = array<i32>} : memref<8x128xf32, #tpu.memory_space<vmem>>, vector<8x128xf32>,
    return
  }
  func.func @transform_0(%arg0: i32) -> (i32, i32) {
    %c0_i32 = arith.constant 0 : i32
    %c0_i32_0 = arith.constant 0 : i32
    return %arg0, %c0_i32 : i32, i32
  }
  func.func @transform_1(%arg0: i32) -> (i32, i32) {
    %c0_i32 = arith.constant 0 : i32
    %c0_i32_0 = arith.constant 0 : i32
    %c0_i32_1 = arith.constant 0 : i32
    return %c0_i32, %c0_i32_0 : i32, i32
  }
  func.func @transform_2(%arg0: i32) -> (i32, i32) {
    %c0_i32 = arith.constant 0 : i32
    %c0_i32_0 = arith.constant 0 : i32
    %c0_i32_1 = arith.constant 0 : i32
    return %c0_i32, %c0_i32_0 : i32, i32
  }
  func.func @transform_3(%arg0: i32) -> (i32, i32) {
    %c0_i32 = arith.constant 0 : i32
    %c0_i32_0 = arith.constant 0 : i32
    %c0_i32_1 = arith.constant 0 : i32
    return %c0_i32, %c0_i32_0 : i32, i32
  }
  func.func @transform_4(%arg0: i32) -> (i32, i32) {
    %c0_i32 = arith.constant 0 : i32
    %c0_i32_0 = arith.constant 0 : i32
    %c0_i32_1 = arith.constant 0 : i32
    return %c0_i32, %c0_i32_0 : i32, i32
  }
  func.func @transform_5(%arg0: i32) -> (i32, i32) {
    %c0_i32 = arith.constant 0 : i32
    %c0_i32_0 = arith.constant 0 : i32
    %c0_i32_1 = arith.constant 0 : i32
    return %c0_i32, %c0_i32_0 : i32, i32
  }
  func.func @transform_6(%arg0: i32) -> (i32, i32) {
    %c0_i32 = arith.constant 0 : i32
    %c0_i32_0 = arith.constant 0 : i32
    %c0_i32_1 = arith.constant 0 : i32
    return %c0_i32, %c0_i32_0 : i32, i32
  }
  func.func @transform_7(%arg0: i32) -> (i32, i32) {
    %c0_i32 = arith.constant 0 : i32
    %c0_i32_0 = arith.constant 0 : i32
    return %arg0, %c0_i32 : i32, i32
  }
}

</mosaic_0001>

<bundles_post_ra>
// kernel: tpu_custom_call.1
= control target key start
LH: loop header
LB: loop body
LE: loop exit
PB: predicated region body
PF: predicated region fallthrough
CT: control target
= control target key end

     0   :  { %12 = vsyncpa [#allocation5], 0  ;;  %s833_s0 = inlined_call_operand.hbm [shape: f32[8,32], index: 0, kind: input, shape index: {}]   ;;  %s834_s1 = inlined_call_operand.hbm [shape: f32[32,128], index: 1, kind: input, shape index: {}]   ;;  %s835_s2 = inlined_call_operand.vmem [shape: f32[1,128], index: 2, kind: input, shape index: {}]   ;;  %s836_s3 = inlined_call_operand.hbm [shape: f32[128,128], index: 3, kind: input, shape index: {}]   ;;  %s837_s4 = inlined_call_operand.vmem [shape: f32[1,128], index: 4, kind: input, shape index: {}]   ;;  %s838_s5 = inlined_call_operand.hbm [shape: f32[128,128], index: 5, kind: input, shape index: {}]   ;;  %s839_s6 = inlined_call_operand.vmem [shape: f32[1,128], index: 6, kind: input, shape index: {}]   ;;  %s840_s7 = inlined_call_operand.hbm [shape: f32[8,128], index: 7, kind: output, shape index: {}]  }
   0x1   :  { %13 = vsyncpa [#allocation8], 0 }
   0x2   :  { %14 = vsyncpa [#allocation11], 0 }
   0x3   :  { %15 = vsyncpa [#allocation6], 0  ;;  %s684_s24 = smov [#allocation7]   ;;  %s566_s28 = scalar_lea.hbm %s834_s1, 512 }
   0x4   :  { %s31_s25 = sshll.u32 %s684_s24, 4  ;;  %p567_p0 = scmp.ne.s32.totalorder %s834_s1, %s566_s28  ;;  %s32_s25 = int_to_ptr.vmem [resolvable:$true] %s31_s25 }
   0x5   :  { %p570_p1 = scmp.lt.u32.totalorder %s566_s28, %s834_s1 }
   0x7   :  { %p572_p2 = pnand %p570_p1, %p567_p0 }
   0x9   :  { %575 = shalt.err (!%p572_p2)
}
   0xa   :  { %s576_s10 = scalar_lea.vmem %s32_s25, 512  ;;  %p581_p4 = scmp.lt.s32.totalorder %s32_s25, %s32_s25 }
   0xb   :  { %p577_p3 = scmp.ne.s32.totalorder %s32_s25, %s576_s10  ;;  %p582_p5 = scmp.lt.s32.totalorder %s576_s10, %s576_s10 }
   0xd   :  { %p583_p6 = por %p582_p5, %p581_p4 }
   0xf   :  { %p584_p7 = pnand %p583_p6, %p577_p3 }
  0x11   :  { %587 = shalt.err (!%p584_p7)
}
  0x12   :  { %s685_s11 = smov 128   ;;  %s686_s12 = smov 8  }
  0x13   :  { %37 = dma.hbm_to_vmem [thread:$0]  %s834_s1, 512, %s32_s25, [#allocation8], %s685_s11, %s685_s11, %s686_s12  }
  0x14   :  { %s687_s15 = smov [#allocation4]   ;;  %s688_s17 = smov [#allocation9]  }
  0x15   :  { %s22_s16 = sshll.u32 %s687_s15, 4  ;;  %s45_s18 = sshll.u32 %s688_s17, 4  ;;  %s23_s16 = int_to_ptr.vmem [resolvable:$true] %s22_s16  ;;  %s46_s18 = int_to_ptr.vmem [resolvable:$true] %s45_s18 }
  0x16   :  { %s588_s21 = scalar_lea.hbm %s833_s0, 128 }
  0x17   :  { %p589_p8 = scmp.ne.s32.totalorder %s833_s0, %s588_s21  ;;  %p592_p9 = scmp.lt.u32.totalorder %s588_s21, %s833_s0 }
  0x19   :  { %p594_p10 = pnand %p592_p9, %p589_p8 }
  0x1b   :  { %597 = shalt.err (!%p594_p10)
}
  0x1c   :  { %s598_s1 = scalar_lea.vmem %s23_s16, 128  ;;  %p603_p12 = scmp.lt.s32.totalorder %s23_s16, %s23_s16 }
  0x1d   :  { %p599_p11 = scmp.ne.s32.totalorder %s23_s16, %s598_s1  ;;  %p604_p13 = scmp.lt.s32.totalorder %s598_s1, %s598_s1 }
  0x1f   :  { %p605_p0 = por %p604_p13, %p603_p12 }
  0x21   :  { %p606_p1 = pnand %p605_p0, %p599_p11 }
  0x23   :  { %609 = shalt.err (!%p606_p1)
}
  0x24   :  { %25 = dma.hbm_to_vmem [thread:$0]  %s833_s0, 128, %s23_s16, [#allocation5]  }
  0x25   :  { %s610_s30 = scalar_lea.hbm %s836_s3, 2048 }
  0x26   :  { %p611_p2 = scmp.ne.s32.totalorder %s836_s3, %s610_s30  ;;  %p614_p3 = scmp.lt.u32.totalorder %s610_s30, %s836_s3 }
  0x28   :  { %p616_p4 = pnand %p614_p3, %p611_p2 }
  0x2a   :  { %619 = shalt.err (!%p616_p4)
}
  0x2b   :  { %s620_s14 = scalar_lea.vmem %s46_s18, 2048  ;;  %p625_p6 = scmp.lt.s32.totalorder %s46_s18, %s46_s18 }
  0x2c   :  { %p621_p5 = scmp.ne.s32.totalorder %s46_s18, %s620_s14  ;;  %p626_p7 = scmp.lt.s32.totalorder %s620_s14, %s620_s14 }
  0x2e   :  { %p627_p8 = por %p626_p7, %p625_p6 }
  0x30   :  { %p628_p9 = pnand %p627_p8, %p621_p5 }
  0x32   :  { %631 = shalt.err (!%p628_p9)
}
  0x33   :  { %51 = dma.hbm_to_vmem [thread:$0]  %s836_s3, 2048, %s46_s18, [#allocation8], %s685_s11, %s685_s11, %s686_s12  }
  0x34   :  { %s689_s16 = smov [#allocation10]   ;;  %s632_s21 = scalar_lea.hbm %s838_s5, 2048 }
  0x35   :  { %s59_s17 = sshll.u32 %s689_s16, 4  ;;  %p633_p10 = scmp.ne.s32.totalorder %s838_s5, %s632_s21  ;;  %s60_s17 = int_to_ptr.vmem [resolvable:$true] %s59_s17 }
  0x36   :  { %p636_p11 = scmp.lt.u32.totalorder %s632_s21, %s838_s5 }
  0x38   :  { %p638_p12 = pnand %p636_p11, %p633_p10 }
  0x3a   :  { %641 = shalt.err (!%p638_p12)
}
  0x3b   :  { %s642_s1 = scalar_lea.vmem %s60_s17, 2048  ;;  %p647_p0 = scmp.lt.s32.totalorder %s60_s17, %s60_s17 }
  0x3c   :  { %p643_p13 = scmp.ne.s32.totalorder %s60_s17, %s642_s1  ;;  %p648_p1 = scmp.lt.s32.totalorder %s642_s1, %s642_s1 }
  0x3e   :  { %p649_p2 = por %p648_p1, %p647_p0 }
  0x40   :  { %p650_p3 = pnand %p649_p2, %p643_p13 }
  0x42   :  { %653 = shalt.err (!%p650_p3)
}
  0x43   :  { %65 = dma.hbm_to_vmem [thread:$0]  %s838_s5, 2048, %s60_s17, [#allocation11], %s685_s11, %s685_s11, %s686_s12  }
  0x44   :  { %676 = dma.done.wait [#allocation5], 128  }
  0x45   :  { %677 = vsyncadd [#allocation5], 4294967168 }
  0x46   :  { %678 = dma.done.wait [#allocation8], 2560  }
  0x47   :  { %679 = vsyncadd [#allocation8], 4294964736 }
  0x48   :  { %680 = dma.done.wait [#allocation11], 2048  }
  0x49   :  { %681 = vsyncadd [#allocation11], 4294965248  ;;  %v690_v0 = vmov 0.0|0.0   ;;  %vm691_vm0 = vmmov 0   ;;  %v692_v1 = vmov 0.0   ;;  %v81_v2 = vld [vmem:[#allocation7] sm:$0xff] }
  0x4a   :  { %502 = vmatprep.subr.bf16.mxu0 %v690_v0  ;;  %429 = vmatprep.mubr.msk.f32.mxu0 %vm691_vm0, %v692_v1  ;;  %v82_v3 = vld [vmem:[#allocation7 + $0x8] sm:$0xff]  ;;  %v83_v4 = vld [vmem:[#allocation7 + $0x10] sm:$0xff]  ;;  %v84_v6 = vld [vmem:[#allocation7 + $0x18] sm:$0xff]  ;;  %vm85_vm1 = vcmask 261120   ;;  %s693_s28 = smov [#allocation12]  }
  0x4b   :  { %508 = vmatprep.subr.bf16.mxu1 %v690_v0  ;;  %464 = vmatprep.mubr.msk.f32.mxu1 %vm691_vm0, %v692_v1  ;;  %v503_v5 = vpack.c.bf16 %v82_v3, %v81_v2  ;;  %v170_v7 = vld [vmem:[#allocation9] sm:$0xff]  ;;  %v171_v8 = vld [vmem:[#allocation9 + $0x8] sm:$0xff]  ;;  %v172_v9 = vld [vmem:[#allocation9 + $0x10] sm:$0xff]  ;;  %v506_v11 = vpack.c.bf16 %v84_v6, %v83_v4  ;;  %s367_s29 = sshll.u32 %s693_s28, 4  ;;  %s368_s29 = int_to_ptr.vmem [resolvable:$true] %s367_s29 }
  0x4c   :  { %v173_v10 = vld [vmem:[#allocation9 + $0x18] sm:$0xff]  ;;  %v509_v12 = vpack.c.bf16 %v171_v8, %v170_v7  ;;  %v174_v14 = vld [vmem:[#allocation9 + $0x20] sm:$0xff]  ;;  %v175_v15 = vld [vmem:[#allocation9 + $0x28] sm:$0xff]  ;;  %s654_s30 = scalar_lea.vmem %s368_s29, 128  ;;  %p659_p5 = scmp.lt.s32.totalorder %s368_s29, %s368_s29 }
  0x4d   :  { %504 = vmatpush3.bf16.msra.mxu0 %v503_v5  ;;  %v512_v13 = vpack.c.bf16 %v173_v10, %v172_v9  ;;  %v80_v16 = vld [vmem:[#allocation4] sm:$0xff]  ;;  %v515_v17 = vpack.c.bf16 %v175_v15, %v174_v14  ;;  %v176_v18 = vld [vmem:[#allocation9 + $0x30] sm:$0xff]  ;;  %v178_v21 = vld [vmem:[#allocation9 + $0x40] sm:$0xff]  ;;  %p655_p4 = scmp.ne.s32.totalorder %s368_s29, %s654_s30  ;;  %p660_p6 = scmp.lt.s32.totalorder %s654_s30, %s654_s30 }
  0x4e   :  { %505 = vmatprep.subr.bf16.mxu0 %v690_v0  ;;  %510 = vmatpush3.bf16.msra.mxu1 %v509_v12  ;;  %v177_v19 = vld [vmem:[#allocation9 + $0x38] sm:$0xff]  ;;  %v179_v22 = vld [vmem:[#allocation9 + $0x48] sm:$0xff]  ;;  %v180_v24 = vld [vmem:[#allocation9 + $0x50] sm:$0xff] }
  0x4f   :  { %511 = vmatprep.subr.bf16.mxu1 %v690_v0  ;;  %v518_v20 = vpack.c.bf16 %v177_v19, %v176_v18  ;;  %v521_v23 = vpack.c.bf16 %v179_v22, %v178_v21  ;;  %v181_v25 = vld [vmem:[#allocation9 + $0x58] sm:$0xff]  ;;  %v182_v27 = vld [vmem:[#allocation9 + $0x60] sm:$0xff]  ;;  %v183_v28 = vld [vmem:[#allocation9 + $0x68] sm:$0xff]  ;;  %p661_p7 = por %p660_p6, %p659_p5 }
  0x50   :  { %v524_v26 = vpack.c.bf16 %v181_v25, %v180_v24  ;;  %v527_v29 = vpack.c.bf16 %v183_v28, %v182_v27  ;;  %v184_v30 = vld [vmem:[#allocation9 + $0x70] sm:$0xff]  ;;  %v185_v31 = vld [vmem:[#allocation9 + $0x78] sm:$0xff]  ;;  %v267_v33 = vld [vmem:[#allocation10] sm:$0xff] }
  0x51   :  { %507 = vmatpush3.bf16.msra.mxu0 %v506_v11  ;;  %v530_v32 = vpack.c.bf16 %v185_v31, %v184_v30  ;;  %v268_v34 = vld [vmem:[#allocation10 + $0x8] sm:$0xff]  ;;  %v269_v35 = vld [vmem:[#allocation10 + $0x10] sm:$0xff]  ;;  %v270_v37 = vld [vmem:[#allocation10 + $0x18] sm:$0xff]  ;;  %p662_p8 = pnand %p661_p7, %p655_p4 }
  0x52   :  { %532 = vmatprep.subr.bf16.mxu0 %v690_v0  ;;  %513 = vmatpush3.bf16.msra.mxu1 %v512_v13  ;;  %v533_v36 = vpack.c.bf16 %v268_v34, %v267_v33  ;;  %v536_v38 = vpack.c.bf16 %v270_v37, %v269_v35  ;;  %v271_v39 = vld [vmem:[#allocation10 + $0x20] sm:$0xff]  ;;  %v272_v40 = vld [vmem:[#allocation10 + $0x28] sm:$0xff]  ;;  %v273_v42 = vld [vmem:[#allocation10 + $0x30] sm:$0xff] }
  0x53   :  { %514 = vmatprep.subr.bf16.mxu1 %v690_v0  ;;  %v539_v41 = vpack.c.bf16 %v272_v40, %v271_v39  ;;  %v274_v43 = vld [vmem:[#allocation10 + $0x38] sm:$0xff]  ;;  %v275_v45 = vld [vmem:[#allocation10 + $0x40] sm:$0xff]  ;;  %v276_v46 = vld [vmem:[#allocation10 + $0x48] sm:$0xff] }
  0x54   :  { %430 = vmatmul.mubr.msk.f32.vlgmr.msra.gmra.mrb[0].mxu0 %vm85_vm1, %v80_v16  ;;  %v542_v44 = vpack.c.bf16 %v274_v43, %v273_v42  ;;  %v545_v47 = vpack.c.bf16 %v276_v46, %v275_v45  ;;  %v277_v48 = vld [vmem:[#allocation10 + $0x50] sm:$0xff]  ;;  %v278_v49 = vld [vmem:[#allocation10 + $0x58] sm:$0xff]  ;;  %v279_v51 = vld [vmem:[#allocation10 + $0x60] sm:$0xff] }
  0x55   :  { %499 = vmatprep.mubr.msk.f32.mxu0 %vm691_vm0, %v692_v1  ;;  %534 = vmatpush3.bf16.msra.mxu0 %v533_v36  ;;  %v548_v50 = vpack.c.bf16 %v278_v49, %v277_v48  ;;  %v280_v52 = vld [vmem:[#allocation10 + $0x68] sm:$0xff]  ;;  %v379_v54 = vld [vmem:[%s835_s2] ss:$0 sm:$0xff]  ;;  %v281_v59 = vld [vmem:[#allocation10 + $0x70] sm:$0xff] }
  0x56   :  { %516 = vmatpush3.bf16.msra.mxu1 %v515_v17  ;;  %535 = vmatprep.subr.bf16.mxu0 %v690_v0  ;;  %v551_v53 = vpack.c.bf16 %v280_v52, %v279_v51  ;;  %v282_v60 = vld [vmem:[#allocation10 + $0x78] sm:$0xff] }
  0x57   :  { %517 = vmatprep.subr.bf16.mxu1 %v690_v0  ;;  %v554_v61 = vpack.c.bf16 %v282_v60, %v281_v59  ;;  %v380_v62 = vld [vmem:[%s837_s4] ss:$0 sm:$0xff] }
  0x58   :  { %v381_v3 = vld [vmem:[%s839_s6] ss:$0 sm:$0xff] }
  0x59   :  { %537 = vmatpush3.bf16.msra.mxu0 %v536_v38 }
  0x5a   :  { %519 = vmatpush3.bf16.msra.mxu1 %v518_v20  ;;  %538 = vmatprep.subr.bf16.mxu0 %v690_v0 }
  0x5b   :  { %520 = vmatprep.subr.bf16.mxu1 %v690_v0 }
  0x5d   :  { %540 = vmatpush3.bf16.msra.mxu0 %v539_v41 }
  0x5e   :  { %522 = vmatpush3.bf16.msra.mxu1 %v521_v23  ;;  %541 = vmatprep.subr.bf16.mxu0 %v690_v0 }
  0x5f   :  { %523 = vmatprep.subr.bf16.mxu1 %v690_v0 }
  0x61   :  { %543 = vmatpush3.bf16.msra.mxu0 %v542_v44 }
  0x62   :  { %525 = vmatpush3.bf16.msra.mxu1 %v524_v26  ;;  %544 = vmatprep.subr.bf16.mxu0 %v690_v0 }
  0x63   :  { %526 = vmatprep.subr.bf16.mxu1 %v690_v0 }
  0x65   :  { %546 = vmatpush3.bf16.msra.mxu0 %v545_v47 }
  0x66   :  { %528 = vmatpush3.bf16.msra.mxu1 %v527_v29  ;;  %547 = vmatprep.subr.bf16.mxu0 %v690_v0 }
  0x67   :  { %529 = vmatprep.subr.bf16.mxu1 %v690_v0 }
  0x69   :  { %549 = vmatpush3.bf16.msra.mxu0 %v548_v50 }
  0x6a   :  { %531 = vmatpush3.bf16.msra.mxu1 %v530_v32  ;;  %550 = vmatprep.subr.bf16.mxu0 %v690_v0 }
  0x6d   :  { %552 = vmatpush3.bf16.msra.mxu0 %v551_v53 }
  0x6e   :  { %553 = vmatprep.subr.bf16.mxu0 %v690_v0 }
  0x71   :  { %555 = vmatpush3.bf16.msra.mxu0 %v554_v61 }
 0x127   :  { %v155_v55 = vpop.f32.mrb[0].mxu0 }
 0x128   :  { %v168_v56 = vadd.f32 %v379_v54, %v155_v55  ;;  %v431_v57 = vpop.f32.mrb[1].mxu0 }
 0x12a   :  { %v169_v58 = vmax.f32 %v168_v56, 0.0 }
 0x12c   :  { %465 = vmatmul.mubr.f32.vlgmr.msra.gmra.mrb[0].mxu1 %v169_v58 }
 0x1ff   :  { %v252_v63 = vpop.f32.mrb[0].mxu1 }
 0x200   :  { %v265_v1 = vadd.f32 %v380_v62, %v252_v63  ;;  %v466_v0 = vpop.f32.mrb[1].mxu1 }
 0x202   :  { %v266_v2 = vmax.f32 %v265_v1, 0.0 }
 0x204   :  { %500 = vmatmul.mubr.f32.vlgmr.msra.gmra.mrb[2].mxu0 %v266_v2 }
 0x2d7   :  { %v356_v4 = vpop.f32.mrb[2].mxu0 }
 0x2d8   :  { %v357_v5 = vadd.f32 %v381_v3, %v356_v4  ;;  %v501_v6 = vpop.f32.mrb[3].mxu0 }
 0x2da   :  { %360 = vst [vmem:[#allocation12] sm:$0xff] %v357_v5 }
 0x2db   :  { %665 = shalt.err (!%p662_p8)
}
 0x2dc   :  { %s666_s9 = scalar_lea.hbm %s840_s7, 128 }
 0x2dd   :  { %p667_p9 = scmp.ne.s32.totalorder %s840_s7, %s666_s9  ;;  %p670_p10 = scmp.lt.u32.totalorder %s666_s9, %s840_s7 }
 0x2df   :  { %p672_p11 = pnand %p670_p10, %p667_p9 }
 0x2e1   :  { %675 = shalt.err (!%p672_p11)
}
 0x2e2   :  { %370 = dma.vmem_to_hbm [thread:$0]  %s368_s29, 128, %s840_s7, [#allocation6]  }
 0x2e3   :  { %682 = dma.done.wait [#allocation6], 128  }
 0x2e4   :  { %683 = vsyncadd [#allocation6], 4294967168 }
 0x2e5   :  { %374 = vsyncpa [#allocation5], 1 }
 0x2e6   :  { %375 = vsyncpa [#allocation8], 1 }
 0x2e7   :  { %376 = vsyncpa [#allocation11], 1 }
 0x2e8   :  { %377 = vsyncpa [#allocation6], 1 }

// kernel: tpu_custom_call.1
= control target key start
LH: loop header
LB: loop body
LE: loop exit
PB: predicated region body
PF: predicated region fallthrough
CT: control target
= control target key end

     0   :  { %12 = vsyncpa [#allocation5], 0  ;;  %s833_s0 = inlined_call_operand.hbm [shape: f32[8,32], index: 0, kind: input, shape index: {}]   ;;  %s834_s1 = inlined_call_operand.hbm [shape: f32[32,128], index: 1, kind: input, shape index: {}]   ;;  %s835_s2 = inlined_call_operand.vmem [shape: f32[1,128], index: 2, kind: input, shape index: {}]   ;;  %s836_s3 = inlined_call_operand.hbm [shape: f32[128,128], index: 3, kind: input, shape index: {}]   ;;  %s837_s4 = inlined_call_operand.vmem [shape: f32[1,128], index: 4, kind: input, shape index: {}]   ;;  %s838_s5 = inlined_call_operand.hbm [shape: f32[128,128], index: 5, kind: input, shape index: {}]   ;;  %s839_s6 = inlined_call_operand.vmem [shape: f32[1,128], index: 6, kind: input, shape index: {}]   ;;  %s840_s7 = inlined_call_operand.hbm [shape: f32[8,128], index: 7, kind: output, shape index: {}]  }
   0x1   :  { %13 = vsyncpa [#allocation8], 0 }
   0x2   :  { %14 = vsyncpa [#allocation11], 0 }
   0x3   :  { %15 = vsyncpa [#allocation6], 0  ;;  %s684_s24 = smov [#allocation7]   ;;  %s566_s28 = scalar_lea.hbm %s834_s1, 512 }
   0x4   :  { %s31_s25 = sshll.u32 %s684_s24, 4  ;;  %p567_p0 = scmp.ne.s32.totalorder %s834_s1, %s566_s28  ;;  %s32_s25 = int_to_ptr.vmem [resolvable:$true] %s31_s25 }
   0x5   :  { %p570_p1 = scmp.lt.u32.totalorder %s566_s28, %s834_s1 }
   0x7   :  { %p572_p2 = pnand %p570_p1, %p567_p0 }
   0x9   :  { %575 = shalt.err (!%p572_p2)
}
   0xa   :  { %s576_s10 = scalar_lea.vmem %s32_s25, 512  ;;  %p581_p4 = scmp.lt.s32.totalorder %s32_s25, %s32_s25 }
   0xb   :  { %p577_p3 = scmp.ne.s32.totalorder %s32_s25, %s576_s10  ;;  %p582_p5 = scmp.lt.s32.totalorder %s576_s10, %s576_s10 }
   0xd   :  { %p583_p6 = por %p582_p5, %p581_p4 }
   0xf   :  { %p584_p7 = pnand %p583_p6, %p577_p3 }
  0x11   :  { %587 = shalt.err (!%p584_p7)
}
  0x12   :  { %s685_s11 = smov 128   ;;  %s686_s12 = smov 8  }
  0x13   :  { %37 = dma.hbm_to_vmem [thread:$0]  %s834_s1, 512, %s32_s25, [#allocation8], %s685_s11, %s685_s11, %s686_s12  }
  0x14   :  { %s687_s15 = smov [#allocation4]   ;;  %s688_s17 = smov [#allocation9]  }
  0x15   :  { %s22_s16 = sshll.u32 %s687_s15, 4  ;;  %s45_s18 = sshll.u32 %s688_s17, 4  ;;  %s23_s16 = int_to_ptr.vmem [resolvable:$true] %s22_s16  ;;  %s46_s18 = int_to_ptr.vmem [resolvable:$true] %s45_s18 }
  0x16   :  { %s588_s21 = scalar_lea.hbm %s833_s0, 128 }
  0x17   :  { %p589_p8 = scmp.ne.s32.totalorder %s833_s0, %s588_s21  ;;  %p592_p9 = scmp.lt.u32.totalorder %s588_s21, %s833_s0 }
  0x19   :  { %p594_p10 = pnand %p592_p9, %p589_p8 }
  0x1b   :  { %597 = shalt.err (!%p594_p10)
}
  0x1c   :  { %s598_s1 = scalar_lea.vmem %s23_s16, 128  ;;  %p603_p12 = scmp.lt.s32.totalorder %s23_s16, %s23_s16 }
  0x1d   :  { %p599_p11 = scmp.ne.s32.totalorder %s23_s16, %s598_s1  ;;  %p604_p13 = scmp.lt.s32.totalorder %s598_s1, %s598_s1 }
  0x1f   :  { %p605_p0 = por %p604_p13, %p603_p12 }
  0x21   :  { %p606_p1 = pnand %p605_p0, %p599_p11 }
  0x23   :  { %609 = shalt.err (!%p606_p1)
}
  0x24   :  { %25 = dma.hbm_to_vmem [thread:$0]  %s833_s0, 128, %s23_s16, [#allocation5]  }
  0x25   :  { %s610_s30 = scalar_lea.hbm %s836_s3, 2048 }
  0x26   :  { %p611_p2 = scmp.ne.s32.totalorder %s836_s3, %s610_s30  ;;  %p614_p3 = scmp.lt.u32.totalorder %s610_s30, %s836_s3 }
  0x28   :  { %p616_p4 = pnand %p614_p3, %p611_p2 }
  0x2a   :  { %619 = shalt.err (!%p616_p4)
}
  0x2b   :  { %s620_s14 = scalar_lea.vmem %s46_s18, 2048  ;;  %p625_p6 = scmp.lt.s32.totalorder %s46_s18, %s46_s18 }
  0x2c   :  { %p621_p5 = scmp.ne.s32.totalorder %s46_s18, %s620_s14  ;;  %p626_p7 = scmp.lt.s32.totalorder %s620_s14, %s620_s14 }
  0x2e   :  { %p627_p8 = por %p626_p7, %p625_p6 }
  0x30   :  { %p628_p9 = pnand %p627_p8, %p621_p5 }
  0x32   :  { %631 = shalt.err (!%p628_p9)
}
  0x33   :  { %51 = dma.hbm_to_vmem [thread:$0]  %s836_s3, 2048, %s46_s18, [#allocation8], %s685_s11, %s685_s11, %s686_s12  }
  0x34   :  { %s689_s16 = smov [#allocation10]   ;;  %s632_s21 = scalar_lea.hbm %s838_s5, 2048 }
  0x35   :  { %s59_s17 = sshll.u32 %s689_s16, 4  ;;  %p633_p10 = scmp.ne.s32.totalorder %s838_s5, %s632_s21  ;;  %s60_s17 = int_to_ptr.vmem [resolvable:$true] %s59_s17 }
  0x36   :  { %p636_p11 = scmp.lt.u32.totalorder %s632_s21, %s838_s5 }
  0x38   :  { %p638_p12 = pnand %p636_p11, %p633_p10 }
  0x3a   :  { %641 = shalt.err (!%p638_p12)
}
  0x3b   :  { %s642_s1 = scalar_lea.vmem %s60_s17, 2048  ;;  %p647_p0 = scmp.lt.s32.totalorder %s60_s17, %s60_s17 }
  0x3c   :  { %p643_p13 = scmp.ne.s32.totalorder %s60_s17, %s642_s1  ;;  %p648_p1 = scmp.lt.s32.totalorder %s642_s1, %s642_s1 }
  0x3e   :  { %p649_p2 = por %p648_p1, %p647_p0 }
  0x40   :  { %p650_p3 = pnand %p649_p2, %p643_p13 }
  0x42   :  { %653 = shalt.err (!%p650_p3)
}
  0x43   :  { %65 = dma.hbm_to_vmem [thread:$0]  %s838_s5, 2048, %s60_s17, [#allocation11], %s685_s11, %s685_s11, %s686_s12  }
  0x44   :  { %676 = dma.done.wait [#allocation5], 128  }
  0x45   :  { %677 = vsyncadd [#allocation5], 4294967168 }
  0x46   :  { %678 = dma.done.wait [#allocation8], 2560  }
  0x47   :  { %679 = vsyncadd [#allocation8], 4294964736 }
  0x48   :  { %680 = dma.done.wait [#allocation11], 2048  }
  0x49   :  { %681 = vsyncadd [#allocation11], 4294965248  ;;  %v690_v0 = vmov 0.0|0.0   ;;  %vm691_vm0 = vmmov 0   ;;  %v692_v1 = vmov 0.0   ;;  %v81_v2 = vld [vmem:[#allocation7] sm:$0xff] }
  0x4a   :  { %502 = vmatprep.subr.bf16.mxu0 %v690_v0  ;;  %429 = vmatprep.mubr.msk.f32.mxu0 %vm691_vm0, %v692_v1  ;;  %v82_v3 = vld [vmem:[#allocation7 + $0x8] sm:$0xff]  ;;  %v83_v4 = vld [vmem:[#allocation7 + $0x10] sm:$0xff]  ;;  %v84_v6 = vld [vmem:[#allocation7 + $0x18] sm:$0xff]  ;;  %vm85_vm1 = vcmask 261120   ;;  %s693_s28 = smov [#allocation12]  }
  0x4b   :  { %508 = vmatprep.subr.bf16.mxu1 %v690_v0  ;;  %464 = vmatprep.mubr.msk.f32.mxu1 %vm691_vm0, %v692_v1  ;;  %v503_v5 = vpack.c.bf16 %v82_v3, %v81_v2  ;;  %v170_v7 = vld [vmem:[#allocation9] sm:$0xff]  ;;  %v171_v8 = vld [vmem:[#allocation9 + $0x8] sm:$0xff]  ;;  %v172_v9 = vld [vmem:[#allocation9 + $0x10] sm:$0xff]  ;;  %v506_v11 = vpack.c.bf16 %v84_v6, %v83_v4  ;;  %s367_s29 = sshll.u32 %s693_s28, 4  ;;  %s368_s29 = int_to_ptr.vmem [resolvable:$true] %s367_s29 }
  0x4c   :  { %v173_v10 = vld [vmem:[#allocation9 + $0x18] sm:$0xff]  ;;  %v509_v12 = vpack.c.bf16 %v171_v8, %v170_v7  ;;  %v174_v14 = vld [vmem:[#allocation9 + $0x20] sm:$0xff]  ;;  %v175_v15 = vld [vmem:[#allocation9 + $0x28] sm:$0xff]  ;;  %s654_s30 = scalar_lea.vmem %s368_s29, 128  ;;  %p659_p5 = scmp.lt.s32.totalorder %s368_s29, %s368_s29 }
  0x4d   :  { %504 = vmatpush3.bf16.msra.mxu0 %v503_v5  ;;  %v512_v13 = vpack.c.bf16 %v173_v10, %v172_v9  ;;  %v80_v16 = vld [vmem:[#allocation4] sm:$0xff]  ;;  %v515_v17 = vpack.c.bf16 %v175_v15, %v174_v14  ;;  %v176_v18 = vld [vmem:[#allocation9 + $0x30] sm:$0xff]  ;;  %v178_v21 = vld [vmem:[#allocation9 + $0x40] sm:$0xff]  ;;  %p655_p4 = scmp.ne.s32.totalorder %s368_s29, %s654_s30  ;;  %p660_p6 = scmp.lt.s32.totalorder %s654_s30, %s654_s30 }
  0x4e   :  { %505 = vmatprep.subr.bf16.mxu0 %v690_v0  ;;  %510 = vmatpush3.bf16.msra.mxu1 %v509_v12  ;;  %v177_v19 = vld [vmem:[#allocation9 + $0x38] sm:$0xff]  ;;  %v179_v22 = vld [vmem:[#allocation9 + $0x48] sm:$0xff]  ;;  %v180_v24 = vld [vmem:[#allocation9 + $0x50] sm:$0xff] }
  0x4f   :  { %511 = vmatprep.subr.bf16.mxu1 %v690_v0  ;;  %v518_v20 = vpack.c.bf16 %v177_v19, %v176_v18  ;;  %v521_v23 = vpack.c.bf16 %v179_v22, %v178_v21  ;;  %v181_v25 = vld [vmem:[#allocation9 + $0x58] sm:$0xff]  ;;  %v182_v27 = vld [vmem:[#allocation9 + $0x60] sm:$0xff]  ;;  %v183_v28 = vld [vmem:[#allocation9 + $0x68] sm:$0xff]  ;;  %p661_p7 = por %p660_p6, %p659_p5 }
  0x50   :  { %v524_v26 = vpack.c.bf16 %v181_v25, %v180_v24  ;;  %v527_v29 = vpack.c.bf16 %v183_v28, %v182_v27  ;;  %v184_v30 = vld [vmem:[#allocation9 + $0x70] sm:$0xff]  ;;  %v185_v31 = vld [vmem:[#allocation9 + $0x78] sm:$0xff]  ;;  %v267_v33 = vld [vmem:[#allocation10] sm:$0xff] }
  0x51   :  { %507 = vmatpush3.bf16.msra.mxu0 %v506_v11  ;;  %v530_v32 = vpack.c.bf16 %v185_v31, %v184_v30  ;;  %v268_v34 = vld [vmem:[#allocation10 + $0x8] sm:$0xff]  ;;  %v269_v35 = vld [vmem:[#allocation10 + $0x10] sm:$0xff]  ;;  %v270_v37 = vld [vmem:[#allocation10 + $0x18] sm:$0xff]  ;;  %p662_p8 = pnand %p661_p7, %p655_p4 }
  0x52   :  { %532 = vmatprep.subr.bf16.mxu0 %v690_v0  ;;  %513 = vmatpush3.bf16.msra.mxu1 %v512_v13  ;;  %v533_v36 = vpack.c.bf16 %v268_v34, %v267_v33  ;;  %v536_v38 = vpack.c.bf16 %v270_v37, %v269_v35  ;;  %v271_v39 = vld [vmem:[#allocation10 + $0x20] sm:$0xff]  ;;  %v272_v40 = vld [vmem:[#allocation10 + $0x28] sm:$0xff]  ;;  %v273_v42 = vld [vmem:[#allocation10 + $0x30] sm:$0xff] }
  0x53   :  { %514 = vmatprep.subr.bf16.mxu1 %v690_v0  ;;  %v539_v41 = vpack.c.bf16 %v272_v40, %v271_v39  ;;  %v274_v43 = vld [vmem:[#allocation10 + $0x38] sm:$0xff]  ;;  %v275_v45 = vld [vmem:[#allocation10 + $0x40] sm:$0xff]  ;;  %v276_v46 = vld [vmem:[#allocation10 + $0x48] sm:$0xff] }
  0x54   :  { %430 = vmatmul.mubr.msk.f32.vlgmr.msra.gmra.mrb[0].mxu0 %vm85_vm1, %v80_v16  ;;  %v542_v44 = vpack.c.bf16 %v274_v43, %v273_v42  ;;  %v545_v47 = vpack.c.bf16 %v276_v46, %v275_v45  ;;  %v277_v48 = vld [vmem:[#allocation10 + $0x50] sm:$0xff]  ;;  %v278_v49 = vld [vmem:[#allocation10 + $0x58] sm:$0xff]  ;;  %v279_v51 = vld [vmem:[#allocation10 + $0x60] sm:$0xff] }
  0x55   :  { %499 = vmatprep.mubr.msk.f32.mxu0 %vm691_vm0, %v692_v1  ;;  %534 = vmatpush3.bf16.msra.mxu0 %v533_v36  ;;  %v548_v50 = vpack.c.bf16 %v278_v49, %v277_v48  ;;  %v280_v52 = vld [vmem:[#allocation10 + $0x68] sm:$0xff]  ;;  %v379_v54 = vld [vmem:[%s835_s2] ss:$0 sm:$0xff]  ;;  %v281_v59 = vld [vmem:[#allocation10 + $0x70] sm:$0xff] }
  0x56   :  { %516 = vmatpush3.bf16.msra.mxu1 %v515_v17  ;;  %535 = vmatprep.subr.bf16.mxu0 %v690_v0  ;;  %v551_v53 = vpack.c.bf16 %v280_v52, %v279_v51  ;;  %v282_v60 = vld [vmem:[#allocation10 + $0x78] sm:$0xff] }
  0x57   :  { %517 = vmatprep.subr.bf16.mxu1 %v690_v0  ;;  %v554_v61 = vpack.c.bf16 %v282_v60, %v281_v59  ;;  %v380_v62 = vld [vmem:[%s837_s4] ss:$0 sm:$0xff] }
  0x58   :  { %v381_v3 = vld [vmem:[%s839_s6] ss:$0 sm:$0xff] }
  0x59   :  { %537 = vmatpush3.bf16.msra.mxu0 %v536_v38 }
  0x5a   :  { %519 = vmatpush3.bf16.msra.mxu1 %v518_v20  ;;  %538 = vmatprep.subr.bf16.mxu0 %v690_v0 }
  0x5b   :  { %520 = vmatprep.subr.bf16.mxu1 %v690_v0 }
  0x5d   :  { %540 = vmatpush3.bf16.msra.mxu0 %v539_v41 }
  0x5e   :  { %522 = vmatpush3.bf16.msra.mxu1 %v521_v23  ;;  %541 = vmatprep.subr.bf16.mxu0 %v690_v0 }
  0x5f   :  { %523 = vmatprep.subr.bf16.mxu1 %v690_v0 }
  0x61   :  { %543 = vmatpush3.bf16.msra.mxu0 %v542_v44 }
  0x62   :  { %525 = vmatpush3.bf16.msra.mxu1 %v524_v26  ;;  %544 = vmatprep.subr.bf16.mxu0 %v690_v0 }
  0x63   :  { %526 = vmatprep.subr.bf16.mxu1 %v690_v0 }
  0x65   :  { %546 = vmatpush3.bf16.msra.mxu0 %v545_v47 }
  0x66   :  { %528 = vmatpush3.bf16.msra.mxu1 %v527_v29  ;;  %547 = vmatprep.subr.bf16.mxu0 %v690_v0 }
  0x67   :  { %529 = vmatprep.subr.bf16.mxu1 %v690_v0 }
  0x69   :  { %549 = vmatpush3.bf16.msra.mxu0 %v548_v50 }
  0x6a   :  { %531 = vmatpush3.bf16.msra.mxu1 %v530_v32  ;;  %550 = vmatprep.subr.bf16.mxu0 %v690_v0 }
  0x6d   :  { %552 = vmatpush3.bf16.msra.mxu0 %v551_v53 }
  0x6e   :  { %553 = vmatprep.subr.bf16.mxu0 %v690_v0 }
  0x71   :  { %555 = vmatpush3.bf16.msra.mxu0 %v554_v61 }
 0x127   :  { %v155_v55 = vpop.f32.mrb[0].mxu0 }
 0x128   :  { %v168_v56 = vadd.f32 %v379_v54, %v155_v55  ;;  %v431_v57 = vpop.f32.mrb[1].mxu0 }
 0x12a   :  { %v169_v58 = vmax.f32 %v168_v56, 0.0 }
 0x12c   :  { %465 = vmatmul.mubr.f32.vlgmr.msra.gmra.mrb[0].mxu1 %v169_v58 }
 0x1ff   :  { %v252_v63 = vpop.f32.mrb[0].mxu1 }
 0x200   :  { %v265_v1 = vadd.f32 %v380_v62, %v252_v63  ;;  %v466_v0 = vpop.f32.mrb[1].mxu1 }
 0x202   :  { %v266_v2 = vmax.f32 %v265_v1, 0.0 }
 0x204   :  { %500 = vmatmul.mubr.f32.vlgmr.msra.gmra.mrb[2].mxu0 %v266_v2 }
 0x2d7   :  { %v356_v4 = vpop.f32.mrb[2].mxu0 }
 0x2d8   :  { %v357_v5 = vadd.f32 %v381_v3, %v356_v4  ;;  %v501_v6 = vpop.f32.mrb[3].mxu0 }
 0x2da   :  { %360 = vst [vmem:[#allocation12] sm:$0xff] %v357_v5 }
 0x2db   :  { %665 = shalt.err (!%p662_p8)
}
 0x2dc   :  { %s666_s9 = scalar_lea.hbm %s840_s7, 128 }
 0x2dd   :  { %p667_p9 = scmp.ne.s32.totalorder %s840_s7, %s666_s9  ;;  %p670_p10 = scmp.lt.u32.totalorder %s666_s9, %s840_s7 }
 0x2df   :  { %p672_p11 = pnand %p670_p10, %p667_p9 }
 0x2e1   :  { %675 = shalt.err (!%p672_p11)
}
 0x2e2   :  { %370 = dma.vmem_to_hbm [thread:$0]  %s368_s29, 128, %s840_s7, [#allocation6]  }
 0x2e3   :  { %682 = dma.done.wait [#allocation6], 128  }
 0x2e4   :  { %683 = vsyncadd [#allocation6], 4294967168 }
 0x2e5   :  { %374 = vsyncpa [#allocation5], 1 }
 0x2e6   :  { %375 = vsyncpa [#allocation8], 1 }
 0x2e7   :  { %376 = vsyncpa [#allocation11], 1 }
 0x2e8   :  { %377 = vsyncpa [#allocation6], 1 }

</bundles_post_ra>
